<compile_context>
chip_gen: v7x
topology: tpu7x:2x2x1
jax: 0.10.0
libtpu: 0.0.40
codegen_flags: <defaults>
</compile_context>

<pallas_src>
import jax
import jax.numpy as jnp
from jax.experimental import pallas as pl
from jax.experimental.pallas import tpu as pltpu


def _rnn_fused_kernel(x_ref, h0_ref, wx_ref, wh_ref, b_ref, out_ref, hfin_ref):
    """All T timesteps of the Elman cell in a single invocation.

    x_ref   : [T, Bp, D]   full input sequence (resident in VMEM)
    h0_ref  : [Bp, D]      initial hidden
    wx_ref  : [D, D+O]     fused weights acting on x   ([Wh_x | Wo_x])
    wh_ref  : [D, D+O]     fused weights acting on h   ([Wh_h | Wo_h])
    b_ref   : [Bp, D+O]    fused bias, pre-broadcast on host
    out_ref : [Bp, T*O]    lane-dense log-softmax outputs (step t in lanes t*O:(t+1)*O)
    hfin_ref: [Bp, D]      final hidden state
    """
    T = x_ref.shape[0]
    D = h0_ref.shape[-1]

    # Load weights / bias / initial hidden once; everything below is values.
    wx = wx_ref[...]
    wh = wh_ref[...]
    bias = b_ref[...]           # already [Bp, D+O]; no per-step broadcast
    h = h0_ref[...]

    step_outs = []
    for t in range(T):          # static unroll (T is small and fixed)
        x = x_ref[t]            # [Bp, D], static index
        # concat(x, h) @ [W_hidden.T | W_output.T] + [b_h | b_o]
        fused = (jnp.dot(x, wx, preferred_element_type=jnp.float32)
                 + jnp.dot(h, wh, preferred_element_type=jnp.float32)
                 + bias)                                  # [Bp, D+O]
        h = fused[:, :D]        # hidden_linear(concat)
        logits = fused[:, D:]   # output_linear(concat)

        # LogSoftmax along dim=1 (exp/log -> EUP slot, max/sum -> XLU).
        m = jnp.max(logits, axis=1, keepdims=True)
        shifted = logits - m
        lse = jnp.log(jnp.sum(jnp.exp(shifted), axis=1, keepdims=True))
        step_outs.append(shifted - lse)                   # [Bp, O]

    # One lane-dense [Bp, T*O] store + one writeback DMA.
    out_ref[...] = jnp.concatenate(step_outs, axis=1).astype(out_ref.dtype)
    # Final hidden written exactly once.
    hfin_ref[...] = h.astype(hfin_ref.dtype)


def prepare_weights(w_hidden, b_hidden, w_output, b_output):
    """Hoisted, one-time weight layout transform.

    w_hidden: [D, 2D], b_hidden: [D]   (PyTorch nn.Linear layout)
    w_output: [O, 2D], b_output: [O]
    returns wx [D, D+O], wh [D, D+O], b [D+O]  (all float32)
    """
    D = w_hidden.shape[0]
    wh_t = w_hidden.T                                   # [2D, D]
    wo_t = w_output.T                                   # [2D, O]
    wx = jnp.concatenate([wh_t[:D], wo_t[:D]], axis=1).astype(jnp.float32)
    wh = jnp.concatenate([wh_t[D:], wo_t[D:]], axis=1).astype(jnp.float32)
    b = jnp.concatenate([b_hidden, b_output]).astype(jnp.float32)
    return wx, wh, b


@jax.jit
def rnn_sequence_forward(x_seq, h0, wx, wh, b):
    """Run T Elman-RNN steps in a single fused Pallas kernel.

    x_seq: [T, B, D], h0: [B, D]
    wx/wh/b: pre-fused weights from prepare_weights().
    returns (log_probs [T, B, O], final_hidden [B, D])
    """
    T, B, D = x_seq.shape
    DO = wx.shape[1]
    O = DO - D

    # Pad batch up to a multiple of the sublane width (8, min 8) so vreg
    # sublanes / MXU rows are packed; padded rows are sliced off afterwards.
    Bp = max(8, -(-B // 8) * 8)
    if Bp != B:
        x_seq = jnp.pad(x_seq, ((0, 0), (0, Bp - B), (0, 0)))
        h0 = jnp.pad(h0, ((0, Bp - B), (0, 0)))
    x_seq = x_seq.astype(jnp.float32)
    h0 = h0.astype(jnp.float32)
    # Bias broadcast hoisted to the host (done once, outside the step loop).
    b_full = jnp.broadcast_to(b.reshape(1, DO), (Bp, DO)).astype(jnp.float32)

    out_flat, h_fin = pl.pallas_call(
        _rnn_fused_kernel,
        out_shape=(jax.ShapeDtypeStruct((Bp, T * O), jnp.float32),
                   jax.ShapeDtypeStruct((Bp, D), jnp.float32)),
        grid=(1,),
        in_specs=[
            pl.BlockSpec((T, Bp, D), lambda i: (0, 0, 0)),   # full sequence, resident
            pl.BlockSpec((Bp, D), lambda i: (0, 0)),         # h0
            pl.BlockSpec((D, DO), lambda i: (0, 0)),          # Wx
            pl.BlockSpec((D, DO), lambda i: (0, 0)),          # Wh
            pl.BlockSpec((Bp, DO), lambda i: (0, 0)),         # bias (pre-broadcast)
        ],
        out_specs=(
            pl.BlockSpec((Bp, T * O), lambda i: (0, 0)),      # lane-dense log-probs
            pl.BlockSpec((Bp, D), lambda i: (0, 0)),          # final hidden
        ),
        compiler_params=pltpu.CompilerParams(
            dimension_semantics=("arbitrary",)),
    )(x_seq, h0, wx, wh, b_full)

    # [Bp, T*O] -> [T, B, O] (layout plumbing under jit, outside the kernel).
    out = out_flat[:B].reshape(B, T, O).transpose(1, 0, 2)
    return out, h_fin[:B]


def rnn_forward(x, h, w_hidden, b_hidden, w_output, b_output):
    """Single-step forward matching the PyTorch module's forward(input, hidden)."""
    wx, wh, b = prepare_weights(w_hidden, b_hidden, w_output, b_output)
    out, new_h = rnn_sequence_forward(x[None], h, wx, wh, b)
    return out[0], new_h


def rnn_step_ref(x, h, w_hidden, b_hidden, w_output, b_output):
    concat = jnp.concatenate([x, h], axis=1)
    new_h = concat @ w_hidden.T + b_hidden
    logits = concat @ w_output.T + b_output
    return jax.nn.log_softmax(logits, axis=1), new_h


if __name__ == "__main__":
    # input_size=32, output_size=16, batch=2, sequence length T=8.
    B, D, O, T = 2, 32, 16, 8
    key = jax.random.PRNGKey(0)
    k1, k2, k3, k4, k5 = jax.random.split(key, 5)

    x_seq = jax.random.normal(k1, (T, B, D), dtype=jnp.float32)        # one "letter" per step
    h0 = jnp.zeros((B, D), dtype=jnp.float32)                          # init_hidden()
    w_hidden = jax.random.normal(k2, (D, 2 * D), dtype=jnp.float32) * 0.1
    b_hidden = jax.random.normal(k3, (D,), dtype=jnp.float32) * 0.1
    w_output = jax.random.normal(k4, (O, 2 * D), dtype=jnp.float32) * 0.1
    b_output = jax.random.normal(k5, (O,), dtype=jnp.float32) * 0.1

    # One-time weight layout transform (hoisted out of the step loop).
    wx, wh, b = prepare_weights(w_hidden, b_hidden, w_output, b_output)

    # Fused sequence kernel.
    out_seq, h_fin = rnn_sequence_forward(x_seq, h0, wx, wh, b)
    jax.block_until_ready((out_seq, h_fin))

    # Reference: run the module's forward step-by-step in plain JAX.
    h_ref = h0
    outs_ref = []
    for t in range(T):
        o_ref, h_ref = rnn_step_ref(x_seq[t], h_ref, w_hidden, b_hidden,
                                    w_output, b_output)
        outs_ref.append(o_ref)
    out_seq_ref = jnp.stack(outs_ref, axis=0)

    assert jnp.allclose(out_seq, out_seq_ref, atol=1e-5, rtol=1e-5), "seq output mismatch"
    assert jnp.allclose(h_fin, h_ref, atol=1e-5, rtol=1e-5), "final hidden mismatch"

    # Single-step API (module forward parity).
    out1, h1 = rnn_forward(x_seq[0], h0, w_hidden, b_hidden, w_output, b_output)
    jax.block_until_ready((out1, h1))
    out1_ref, h1_ref = rnn_step_ref(x_seq[0], h0, w_hidden, b_hidden, w_output, b_output)
    assert jnp.allclose(out1, out1_ref, atol=1e-5, rtol=1e-5), "step output mismatch"
    assert jnp.allclose(h1, h1_ref, atol=1e-5, rtol=1e-5), "step hidden mismatch"

    print("KERNEL_OK")
</pallas_src>

<mosaic_0001>
module attributes {stable_mosaic.version = 11 : i64} {
  func.func @_rnn_fused_kernel(%arg0: i32, %arg1: memref<8x8x32xf32, #tpu.memory_space<vmem>>, %arg2: memref<8x32xf32, #tpu.memory_space<vmem>>, %arg3: memref<32x48xf32, #tpu.memory_space<vmem>>, %arg4: memref<32x48xf32, #tpu.memory_space<vmem>>, %arg5: memref<8x48xf32, #tpu.memory_space<vmem>>, %arg6: memref<8x128xf32, #tpu.memory_space<vmem>>, %arg7: memref<8x32xf32, #tpu.memory_space<vmem>>) attributes {dimension_semantics = [#tpu.dimension_semantics<arbitrary>], iteration_bounds = array<i64: 1>, scalar_prefetch = 0 : i64, scratch_operands = 0 : i64, tpu.core_type = #tpu.core_type<tc>, window_params = [{pipeline_mode = #tpu.pipeline_mode<synchronous>, transform_indices = @transform_0, window_bounds = array<i64: 8, 8, 32>}, {pipeline_mode = #tpu.pipeline_mode<synchronous>, transform_indices = @transform_1, window_bounds = array<i64: 8, 32>}, {pipeline_mode = #tpu.pipeline_mode<synchronous>, transform_indices = @transform_2, window_bounds = array<i64: 32, 48>}, {pipeline_mode = #tpu.pipeline_mode<synchronous>, transform_indices = @transform_3, window_bounds = array<i64: 32, 48>}, {pipeline_mode = #tpu.pipeline_mode<synchronous>, transform_indices = @transform_4, window_bounds = array<i64: 8, 48>}, {pipeline_mode = #tpu.pipeline_mode<synchronous>, transform_indices = @transform_5, window_bounds = array<i64: 8, 128>}, {pipeline_mode = #tpu.pipeline_mode<synchronous>, transform_indices = @transform_6, window_bounds = array<i64: 8, 32>}]} {
    %c0 = arith.constant 0 : index
    %c0_0 = arith.constant 0 : index
    %0 = vector.load %arg3[%c0, %c0_0] : memref<32x48xf32, #tpu.memory_space<vmem>>, vector<32x48xf32>
    %c0_1 = arith.constant 0 : index
    %c0_2 = arith.constant 0 : index
    %1 = vector.load %arg4[%c0_1, %c0_2] : memref<32x48xf32, #tpu.memory_space<vmem>>, vector<32x48xf32>
    %c0_3 = arith.constant 0 : index
    %c0_4 = arith.constant 0 : index
    %2 = vector.load %arg5[%c0_3, %c0_4] : memref<8x48xf32, #tpu.memory_space<vmem>>, vector<8x48xf32>
    %c0_5 = arith.constant 0 : index
    %c0_6 = arith.constant 0 : index
    %3 = vector.load %arg2[%c0_5, %c0_6] : memref<8x32xf32, #tpu.memory_space<vmem>>, vector<8x32xf32>
    %c0_7 = arith.constant 0 : index
    %c0_8 = arith.constant 0 : index
    %c0_9 = arith.constant 0 : index
    %4 = vector.load %arg1[%c0_7, %c0_8, %c0_9] : memref<8x8x32xf32, #tpu.memory_space<vmem>>, vector<1x8x32xf32>
    %5 = vector.shape_cast %4 : vector<1x8x32xf32> to vector<8x32xf32>
    %cst = arith.constant dense<0.000000e+00> : vector<8x48xf32>
    %6 = tpu.matmul %5, %0, %cst {dimension_numbers = #tpu.dot_dimension_numbers<[1], [0], [0], [1], [0, 0, 1, 1], [], []>} : vector<8x32xf32>, vector<32x48xf32>, vector<8x48xf32> -> vector<8x48xf32>
    %cst_10 = arith.constant dense<0.000000e+00> : vector<8x48xf32>
    %7 = tpu.matmul %3, %1, %cst_10 {dimension_numbers = #tpu.dot_dimension_numbers<[1], [0], [0], [1], [0, 0, 1, 1], [], []>} : vector<8x32xf32>, vector<32x48xf32>, vector<8x48xf32> -> vector<8x48xf32>
    %8 = arith.addf %6, %7 : vector<8x48xf32>
    %9 = arith.addf %8, %2 : vector<8x48xf32>
    %10 = vector.extract_strided_slice %9 {offsets = [0, 0], sizes = [8, 32], strides = [1, 1]} : vector<8x48xf32> to vector<8x32xf32>
    %11 = vector.extract_strided_slice %9 {offsets = [0, 32], sizes = [8, 16], strides = [1, 1]} : vector<8x48xf32> to vector<8x16xf32>
    %cst_11 = arith.constant dense<0xFF800000> : vector<8xf32>
    %12 = vector.multi_reduction <maximumf>, %11, %cst_11 [1] : vector<8x16xf32> to vector<8xf32>
    %13 = vector.shape_cast %12 : vector<8xf32> to vector<8x1xf32>
    %14 = vector.broadcast %13 : vector<8x1xf32> to vector<8x16xf32>
    %15 = arith.subf %11, %14 : vector<8x16xf32>
    %16 = math.exp %15 : vector<8x16xf32>
    %cst_12 = arith.constant dense<0.000000e+00> : vector<8xf32>
    %17 = vector.multi_reduction <add>, %16, %cst_12 [1] : vector<8x16xf32> to vector<8xf32>
    %18 = vector.shape_cast %17 : vector<8xf32> to vector<8x1xf32>
    %19 = math.log %18 : vector<8x1xf32>
    %20 = vector.broadcast %19 : vector<8x1xf32> to vector<8x16xf32>
    %21 = arith.subf %15, %20 : vector<8x16xf32>
    %c1 = arith.constant 1 : index
    %c0_13 = arith.constant 0 : index
    %c0_14 = arith.constant 0 : index
    %22 = vector.load %arg1[%c1, %c0_13, %c0_14] : memref<8x8x32xf32, #tpu.memory_space<vmem>>, vector<1x8x32xf32>
    %23 = vector.shape_cast %22 : vector<1x8x32xf32> to vector<8x32xf32>
    %cst_15 = arith.constant dense<0.000000e+00> : vector<8x48xf32>
    %24 = tpu.matmul %23, %0, %cst_15 {dimension_numbers = #tpu.dot_dimension_numbers<[1], [0], [0], [1], [0, 0, 1, 1], [], []>} : vector<8x32xf32>, vector<32x48xf32>, vector<8x48xf32> -> vector<8x48xf32>
    %cst_16 = arith.constant dense<0.000000e+00> : vector<8x48xf32>
    %25 = tpu.matmul %10, %1, %cst_16 {dimension_numbers = #tpu.dot_dimension_numbers<[1], [0], [0], [1], [0, 0, 1, 1], [], []>} : vector<8x32xf32>, vector<32x48xf32>, vector<8x48xf32> -> vector<8x48xf32>
    %26 = arith.addf %24, %25 : vector<8x48xf32>
    %27 = arith.addf %26, %2 : vector<8x48xf32>
    %28 = vector.extract_strided_slice %27 {offsets = [0, 0], sizes = [8, 32], strides = [1, 1]} : vector<8x48xf32> to vector<8x32xf32>
    %29 = vector.extract_strided_slice %27 {offsets = [0, 32], sizes = [8, 16], strides = [1, 1]} : vector<8x48xf32> to vector<8x16xf32>
    %cst_17 = arith.constant dense<0xFF800000> : vector<8xf32>
    %30 = vector.multi_reduction <maximumf>, %29, %cst_17 [1] : vector<8x16xf32> to vector<8xf32>
    %31 = vector.shape_cast %30 : vector<8xf32> to vector<8x1xf32>
    %32 = vector.broadcast %31 : vector<8x1xf32> to vector<8x16xf32>
    %33 = arith.subf %29, %32 : vector<8x16xf32>
    %34 = math.exp %33 : vector<8x16xf32>
    %cst_18 = arith.constant dense<0.000000e+00> : vector<8xf32>
    %35 = vector.multi_reduction <add>, %34, %cst_18 [1] : vector<8x16xf32> to vector<8xf32>
    %36 = vector.shape_cast %35 : vector<8xf32> to vector<8x1xf32>
    %37 = math.log %36 : vector<8x1xf32>
    %38 = vector.broadcast %37 : vector<8x1xf32> to vector<8x16xf32>
    %39 = arith.subf %33, %38 : vector<8x16xf32>
    %c2 = arith.constant 2 : index
    %c0_19 = arith.constant 0 : index
    %c0_20 = arith.constant 0 : index
    %40 = vector.load %arg1[%c2, %c0_19, %c0_20] : memref<8x8x32xf32, #tpu.memory_space<vmem>>, vector<1x8x32xf32>
    %41 = vector.shape_cast %40 : vector<1x8x32xf32> to vector<8x32xf32>
    %cst_21 = arith.constant dense<0.000000e+00> : vector<8x48xf32>
    %42 = tpu.matmul %41, %0, %cst_21 {dimension_numbers = #tpu.dot_dimension_numbers<[1], [0], [0], [1], [0, 0, 1, 1], [], []>} : vector<8x32xf32>, vector<32x48xf32>, vector<8x48xf32> -> vector<8x48xf32>
    %cst_22 = arith.constant dense<0.000000e+00> : vector<8x48xf32>
    %43 = tpu.matmul %28, %1, %cst_22 {dimension_numbers = #tpu.dot_dimension_numbers<[1], [0], [0], [1], [0, 0, 1, 1], [], []>} : vector<8x32xf32>, vector<32x48xf32>, vector<8x48xf32> -> vector<8x48xf32>
    %44 = arith.addf %42, %43 : vector<8x48xf32>
    %45 = arith.addf %44, %2 : vector<8x48xf32>
    %46 = vector.extract_strided_slice %45 {offsets = [0, 0], sizes = [8, 32], strides = [1, 1]} : vector<8x48xf32> to vector<8x32xf32>
    %47 = vector.extract_strided_slice %45 {offsets = [0, 32], sizes = [8, 16], strides = [1, 1]} : vector<8x48xf32> to vector<8x16xf32>
    %cst_23 = arith.constant dense<0xFF800000> : vector<8xf32>
    %48 = vector.multi_reduction <maximumf>, %47, %cst_23 [1] : vector<8x16xf32> to vector<8xf32>
    %49 = vector.shape_cast %48 : vector<8xf32> to vector<8x1xf32>
    %50 = vector.broadcast %49 : vector<8x1xf32> to vector<8x16xf32>
    %51 = arith.subf %47, %50 : vector<8x16xf32>
    %52 = math.exp %51 : vector<8x16xf32>
    %cst_24 = arith.constant dense<0.000000e+00> : vector<8xf32>
    %53 = vector.multi_reduction <add>, %52, %cst_24 [1] : vector<8x16xf32> to vector<8xf32>
    %54 = vector.shape_cast %53 : vector<8xf32> to vector<8x1xf32>
    %55 = math.log %54 : vector<8x1xf32>
    %56 = vector.broadcast %55 : vector<8x1xf32> to vector<8x16xf32>
    %57 = arith.subf %51, %56 : vector<8x16xf32>
    %c3 = arith.constant 3 : index
    %c0_25 = arith.constant 0 : index
    %c0_26 = arith.constant 0 : index
    %58 = vector.load %arg1[%c3, %c0_25, %c0_26] : memref<8x8x32xf32, #tpu.memory_space<vmem>>, vector<1x8x32xf32>
    %59 = vector.shape_cast %58 : vector<1x8x32xf32> to vector<8x32xf32>
    %cst_27 = arith.constant dense<0.000000e+00> : vector<8x48xf32>
    %60 = tpu.matmul %59, %0, %cst_27 {dimension_numbers = #tpu.dot_dimension_numbers<[1], [0], [0], [1], [0, 0, 1, 1], [], []>} : vector<8x32xf32>, vector<32x48xf32>, vector<8x48xf32> -> vector<8x48xf32>
    %cst_28 = arith.constant dense<0.000000e+00> : vector<8x48xf32>
    %61 = tpu.matmul %46, %1, %cst_28 {dimension_numbers = #tpu.dot_dimension_numbers<[1], [0], [0], [1], [0, 0, 1, 1], [], []>} : vector<8x32xf32>, vector<32x48xf32>, vector<8x48xf32> -> vector<8x48xf32>
    %62 = arith.addf %60, %61 : vector<8x48xf32>
    %63 = arith.addf %62, %2 : vector<8x48xf32>
    %64 = vector.extract_strided_slice %63 {offsets = [0, 0], sizes = [8, 32], strides = [1, 1]} : vector<8x48xf32> to vector<8x32xf32>
    %65 = vector.extract_strided_slice %63 {offsets = [0, 32], sizes = [8, 16], strides = [1, 1]} : vector<8x48xf32> to vector<8x16xf32>
    %cst_29 = arith.constant dense<0xFF800000> : vector<8xf32>
    %66 = vector.multi_reduction <maximumf>, %65, %cst_29 [1] : vector<8x16xf32> to vector<8xf32>
    %67 = vector.shape_cast %66 : vector<8xf32> to vector<8x1xf32>
    %68 = vector.broadcast %67 : vector<8x1xf32> to vector<8x16xf32>
    %69 = arith.subf %65, %68 : vector<8x16xf32>
    %70 = math.exp %69 : vector<8x16xf32>
    %cst_30 = arith.constant dense<0.000000e+00> : vector<8xf32>
    %71 = vector.multi_reduction <add>, %70, %cst_30 [1] : vector<8x16xf32> to vector<8xf32>
    %72 = vector.shape_cast %71 : vector<8xf32> to vector<8x1xf32>
    %73 = math.log %72 : vector<8x1xf32>
    %74 = vector.broadcast %73 : vector<8x1xf32> to vector<8x16xf32>
    %75 = arith.subf %69, %74 : vector<8x16xf32>
    %c4 = arith.constant 4 : index
    %c0_31 = arith.constant 0 : index
    %c0_32 = arith.constant 0 : index
    %76 = vector.load %arg1[%c4, %c0_31, %c0_32] : memref<8x8x32xf32, #tpu.memory_space<vmem>>, vector<1x8x32xf32>
    %77 = vector.shape_cast %76 : vector<1x8x32xf32> to vector<8x32xf32>
    %cst_33 = arith.constant dense<0.000000e+00> : vector<8x48xf32>
    %78 = tpu.matmul %77, %0, %cst_33 {dimension_numbers = #tpu.dot_dimension_numbers<[1], [0], [0], [1], [0, 0, 1, 1], [], []>} : vector<8x32xf32>, vector<32x48xf32>, vector<8x48xf32> -> vector<8x48xf32>
    %cst_34 = arith.constant dense<0.000000e+00> : vector<8x48xf32>
    %79 = tpu.matmul %64, %1, %cst_34 {dimension_numbers = #tpu.dot_dimension_numbers<[1], [0], [0], [1], [0, 0, 1, 1], [], []>} : vector<8x32xf32>, vector<32x48xf32>, vector<8x48xf32> -> vector<8x48xf32>
    %80 = arith.addf %78, %79 : vector<8x48xf32>
    %81 = arith.addf %80, %2 : vector<8x48xf32>
    %82 = vector.extract_strided_slice %81 {offsets = [0, 0], sizes = [8, 32], strides = [1, 1]} : vector<8x48xf32> to vector<8x32xf32>
    %83 = vector.extract_strided_slice %81 {offsets = [0, 32], sizes = [8, 16], strides = [1, 1]} : vector<8x48xf32> to vector<8x16xf32>
    %cst_35 = arith.constant dense<0xFF800000> : vector<8xf32>
    %84 = vector.multi_reduction <maximumf>, %83, %cst_35 [1] : vector<8x16xf32> to vector<8xf32>
    %85 = vector.shape_cast %84 : vector<8xf32> to vector<8x1xf32>
    %86 = vector.broadcast %85 : vector<8x1xf32> to vector<8x16xf32>
    %87 = arith.subf %83, %86 : vector<8x16xf32>
    %88 = math.exp %87 : vector<8x16xf32>
    %cst_36 = arith.constant dense<0.000000e+00> : vector<8xf32>
    %89 = vector.multi_reduction <add>, %88, %cst_36 [1] : vector<8x16xf32> to vector<8xf32>
    %90 = vector.shape_cast %89 : vector<8xf32> to vector<8x1xf32>
    %91 = math.log %90 : vector<8x1xf32>
    %92 = vector.broadcast %91 : vector<8x1xf32> to vector<8x16xf32>
    %93 = arith.subf %87, %92 : vector<8x16xf32>
    %c5 = arith.constant 5 : index
    %c0_37 = arith.constant 0 : index
    %c0_38 = arith.constant 0 : index
    %94 = vector.load %arg1[%c5, %c0_37, %c0_38] : memref<8x8x32xf32, #tpu.memory_space<vmem>>, vector<1x8x32xf32>
    %95 = vector.shape_cast %94 : vector<1x8x32xf32> to vector<8x32xf32>
    %cst_39 = arith.constant dense<0.000000e+00> : vector<8x48xf32>
    %96 = tpu.matmul %95, %0, %cst_39 {dimension_numbers = #tpu.dot_dimension_numbers<[1], [0], [0], [1], [0, 0, 1, 1], [], []>} : vector<8x32xf32>, vector<32x48xf32>, vector<8x48xf32> -> vector<8x48xf32>
    %cst_40 = arith.constant dense<0.000000e+00> : vector<8x48xf32>
    %97 = tpu.matmul %82, %1, %cst_40 {dimension_numbers = #tpu.dot_dimension_numbers<[1], [0], [0], [1], [0, 0, 1, 1], [], []>} : vector<8x32xf32>, vector<32x48xf32>, vector<8x48xf32> -> vector<8x48xf32>
    %98 = arith.addf %96, %97 : vector<8x48xf32>
    %99 = arith.addf %98, %2 : vector<8x48xf32>
    %100 = vector.extract_strided_slice %99 {offsets = [0, 0], sizes = [8, 32], strides = [1, 1]} : vector<8x48xf32> to vector<8x32xf32>
    %101 = vector.extract_strided_slice %99 {offsets = [0, 32], sizes = [8, 16], strides = [1, 1]} : vector<8x48xf32> to vector<8x16xf32>
    %cst_41 = arith.constant dense<0xFF800000> : vector<8xf32>
    %102 = vector.multi_reduction <maximumf>, %101, %cst_41 [1] : vector<8x16xf32> to vector<8xf32>
    %103 = vector.shape_cast %102 : vector<8xf32> to vector<8x1xf32>
    %104 = vector.broadcast %103 : vector<8x1xf32> to vector<8x16xf32>
    %105 = arith.subf %101, %104 : vector<8x16xf32>
    %106 = math.exp %105 : vector<8x16xf32>
    %cst_42 = arith.constant dense<0.000000e+00> : vector<8xf32>
    %107 = vector.multi_reduction <add>, %106, %cst_42 [1] : vector<8x16xf32> to vector<8xf32>
    %108 = vector.shape_cast %107 : vector<8xf32> to vector<8x1xf32>
    %109 = math.log %108 : vector<8x1xf32>
    %110 = vector.broadcast %109 : vector<8x1xf32> to vector<8x16xf32>
    %111 = arith.subf %105, %110 : vector<8x16xf32>
    %c6 = arith.constant 6 : index
    %c0_43 = arith.constant 0 : index
    %c0_44 = arith.constant 0 : index
    %112 = vector.load %arg1[%c6, %c0_43, %c0_44] : memref<8x8x32xf32, #tpu.memory_space<vmem>>, vector<1x8x32xf32>
    %113 = vector.shape_cast %112 : vector<1x8x32xf32> to vector<8x32xf32>
    %cst_45 = arith.constant dense<0.000000e+00> : vector<8x48xf32>
    %114 = tpu.matmul %113, %0, %cst_45 {dimension_numbers = #tpu.dot_dimension_numbers<[1], [0], [0], [1], [0, 0, 1, 1], [], []>} : vector<8x32xf32>, vector<32x48xf32>, vector<8x48xf32> -> vector<8x48xf32>
    %cst_46 = arith.constant dense<0.000000e+00> : vector<8x48xf32>
    %115 = tpu.matmul %100, %1, %cst_46 {dimension_numbers = #tpu.dot_dimension_numbers<[1], [0], [0], [1], [0, 0, 1, 1], [], []>} : vector<8x32xf32>, vector<32x48xf32>, vector<8x48xf32> -> vector<8x48xf32>
    %116 = arith.addf %114, %115 : vector<8x48xf32>
    %117 = arith.addf %116, %2 : vector<8x48xf32>
    %118 = vector.extract_strided_slice %117 {offsets = [0, 0], sizes = [8, 32], strides = [1, 1]} : vector<8x48xf32> to vector<8x32xf32>
    %119 = vector.extract_strided_slice %117 {offsets = [0, 32], sizes = [8, 16], strides = [1, 1]} : vector<8x48xf32> to vector<8x16xf32>
    %cst_47 = arith.constant dense<0xFF800000> : vector<8xf32>
    %120 = vector.multi_reduction <maximumf>, %119, %cst_47 [1] : vector<8x16xf32> to vector<8xf32>
    %121 = vector.shape_cast %120 : vector<8xf32> to vector<8x1xf32>
    %122 = vector.broadcast %121 : vector<8x1xf32> to vector<8x16xf32>
    %123 = arith.subf %119, %122 : vector<8x16xf32>
    %124 = math.exp %123 : vector<8x16xf32>
    %cst_48 = arith.constant dense<0.000000e+00> : vector<8xf32>
    %125 = vector.multi_reduction <add>, %124, %cst_48 [1] : vector<8x16xf32> to vector<8xf32>
    %126 = vector.shape_cast %125 : vector<8xf32> to vector<8x1xf32>
    %127 = math.log %126 : vector<8x1xf32>
    %128 = vector.broadcast %127 : vector<8x1xf32> to vector<8x16xf32>
    %129 = arith.subf %123, %128 : vector<8x16xf32>
    %c7 = arith.constant 7 : index
    %c0_49 = arith.constant 0 : index
    %c0_50 = arith.constant 0 : index
    %130 = vector.load %arg1[%c7, %c0_49, %c0_50] : memref<8x8x32xf32, #tpu.memory_space<vmem>>, vector<1x8x32xf32>
    %131 = vector.shape_cast %130 : vector<1x8x32xf32> to vector<8x32xf32>
    %cst_51 = arith.constant dense<0.000000e+00> : vector<8x48xf32>
    %132 = tpu.matmul %131, %0, %cst_51 {dimension_numbers = #tpu.dot_dimension_numbers<[1], [0], [0], [1], [0, 0, 1, 1], [], []>} : vector<8x32xf32>, vector<32x48xf32>, vector<8x48xf32> -> vector<8x48xf32>
    %cst_52 = arith.constant dense<0.000000e+00> : vector<8x48xf32>
    %133 = tpu.matmul %118, %1, %cst_52 {dimension_numbers = #tpu.dot_dimension_numbers<[1], [0], [0], [1], [0, 0, 1, 1], [], []>} : vector<8x32xf32>, vector<32x48xf32>, vector<8x48xf32> -> vector<8x48xf32>
    %134 = arith.addf %132, %133 : vector<8x48xf32>
    %135 = arith.addf %134, %2 : vector<8x48xf32>
    %136 = vector.extract_strided_slice %135 {offsets = [0, 0], sizes = [8, 32], strides = [1, 1]} : vector<8x48xf32> to vector<8x32xf32>
    %137 = vector.extract_strided_slice %135 {offsets = [0, 32], sizes = [8, 16], strides = [1, 1]} : vector<8x48xf32> to vector<8x16xf32>
    %cst_53 = arith.constant dense<0xFF800000> : vector<8xf32>
    %138 = vector.multi_reduction <maximumf>, %137, %cst_53 [1] : vector<8x16xf32> to vector<8xf32>
    %139 = vector.shape_cast %138 : vector<8xf32> to vector<8x1xf32>
    %140 = vector.broadcast %139 : vector<8x1xf32> to vector<8x16xf32>
    %141 = arith.subf %137, %140 : vector<8x16xf32>
    %142 = math.exp %141 : vector<8x16xf32>
    %cst_54 = arith.constant dense<0.000000e+00> : vector<8xf32>
    %143 = vector.multi_reduction <add>, %142, %cst_54 [1] : vector<8x16xf32> to vector<8xf32>
    %144 = vector.shape_cast %143 : vector<8xf32> to vector<8x1xf32>
    %145 = math.log %144 : vector<8x1xf32>
    %146 = vector.broadcast %145 : vector<8x1xf32> to vector<8x16xf32>
    %147 = arith.subf %141, %146 : vector<8x16xf32>
    %148 = tpu.concatenate %21, %39, %57, %75, %93, %111, %129, %147 in 1 : vector<8x16xf32>, vector<8x16xf32>, vector<8x16xf32>, vector<8x16xf32>, vector<8x16xf32>, vector<8x16xf32>, vector<8x16xf32>, vector<8x16xf32> -> vector<8x128xf32>
    %c0_55 = arith.constant 0 : index
    %c0_56 = arith.constant 0 : index
    %149 = vector.load %arg6[%c0_55, %c0_56] : memref<8x128xf32, #tpu.memory_space<vmem>>, vector<8x128xf32>
    tpu.vector_store %arg6[%c0_55, %c0_56], %148 {strides = array<i32>} : memref<8x128xf32, #tpu.memory_space<vmem>>, vector<8x128xf32>,
    %c0_57 = arith.constant 0 : index
    %c0_58 = arith.constant 0 : index
    %150 = vector.load %arg7[%c0_57, %c0_58] : memref<8x32xf32, #tpu.memory_space<vmem>>, vector<8x32xf32>
    tpu.vector_store %arg7[%c0_57, %c0_58], %136 {strides = array<i32>} : memref<8x32xf32, #tpu.memory_space<vmem>>, vector<8x32xf32>,
    return
  }
  func.func @transform_0(%arg0: i32) -> (i32, i32, i32) {
    %c0_i32 = arith.constant 0 : i32
    %c0_i32_0 = arith.constant 0 : i32
    %c0_i32_1 = arith.constant 0 : i32
    %c0_i32_2 = arith.constant 0 : i32
    return %c0_i32, %c0_i32_0, %c0_i32_1 : i32, i32, i32
  }
  func.func @transform_1(%arg0: i32) -> (i32, i32) {
    %c0_i32 = arith.constant 0 : i32
    %c0_i32_0 = arith.constant 0 : i32
    %c0_i32_1 = arith.constant 0 : i32
    return %c0_i32, %c0_i32_0 : i32, i32
  }
  func.func @transform_2(%arg0: i32) -> (i32, i32) {
    %c0_i32 = arith.constant 0 : i32
    %c0_i32_0 = arith.constant 0 : i32
    %c0_i32_1 = arith.constant 0 : i32
    return %c0_i32, %c0_i32_0 : i32, i32
  }
  func.func @transform_3(%arg0: i32) -> (i32, i32) {
    %c0_i32 = arith.constant 0 : i32
    %c0_i32_0 = arith.constant 0 : i32
    %c0_i32_1 = arith.constant 0 : i32
    return %c0_i32, %c0_i32_0 : i32, i32
  }
  func.func @transform_4(%arg0: i32) -> (i32, i32) {
    %c0_i32 = arith.constant 0 : i32
    %c0_i32_0 = arith.constant 0 : i32
    %c0_i32_1 = arith.constant 0 : i32
    return %c0_i32, %c0_i32_0 : i32, i32
  }
  func.func @transform_5(%arg0: i32) -> (i32, i32) {
    %c0_i32 = arith.constant 0 : i32
    %c0_i32_0 = arith.constant 0 : i32
    %c0_i32_1 = arith.constant 0 : i32
    return %c0_i32, %c0_i32_0 : i32, i32
  }
  func.func @transform_6(%arg0: i32) -> (i32, i32) {
    %c0_i32 = arith.constant 0 : i32
    %c0_i32_0 = arith.constant 0 : i32
    %c0_i32_1 = arith.constant 0 : i32
    return %c0_i32, %c0_i32_0 : i32, i32
  }
}

</mosaic_0001>

<bundles_post_ra>
// kernel: rnn_sequence_forward.1
= control target key start
LH: loop header
LB: loop body
LE: loop exit
PB: predicated region body
PF: predicated region fallthrough
CT: control target
= control target key end

     0   :  { %v1821_v0 = vmov 0.0|0.0   ;;  %vm1822_vm0 = vmmov 0   ;;  %v1823_v8 = vmov 0.0   ;;  %vm33_vm1 = vcmask 261120   ;;  %s1826_s7 = smov 16   ;;  %s1827_s8 = smov 32   ;;  %s2132_s3 = inlined_call_operand.vmem [shape: f32[32,48], index: 3, kind: input, shape index: {}]   ;;  %s2133_s2 = inlined_call_operand.vmem [shape: f32[32,48], index: 2, kind: input, shape index: {}]   ;;  %s2134_s1 = inlined_call_operand.vmem [shape: f32[8,32], index: 1, kind: input, shape index: {}]   ;;  %s2135_s0 = inlined_call_operand.vmem [shape: f32[8,8,32], index: 0, kind: input, shape index: {}]   ;;  %s2136_s4 = inlined_call_operand.vmem [shape: f32[8,48], index: 4, kind: input, shape index: {}]   ;;  %s2137_s6 = inlined_call_operand.vmem [shape: f32[8,32], index: 6, kind: output, shape index: {1}]   ;;  %s2138_s5 = inlined_call_operand.vmem [shape: f32[8,128], index: 5, kind: output, shape index: {0}]  }
   0x1   :  { %1683 = vmatprep.subr.bf16.mxu0 %v1821_v0  ;;  %1689 = vmatprep.subr.bf16.mxu1 %v1821_v0  ;;  %v26_v1 = vld [vmem:[%s2132_s3] sm:$0xff]  ;;  %v27_v2 = vld [vmem:[%s2132_s3 + $0x8] sm:$0xff]  ;;  %v28_v6 = vld [vmem:[%s2132_s3 + $0x10] sm:$0xff]  ;;  %vm181_vm2 = vcmask 392448   ;;  %vm192_vm3 = vcmask 130048   ;;  %s1828_s9 = smov 48  }
   0x2   :  { %v22_v3 = vld [vmem:[%s2133_s2] sm:$0xff]  ;;  %v1877_v4 = vpack.c.bf16 %v27_v2, %v26_v1  ;;  %v23_v5 = vld [vmem:[%s2133_s2 + $0x8] sm:$0xff]  ;;  %v29_v7 = vld [vmem:[%s2132_s3 + $0x18] sm:$0xff]  ;;  %1515 = vmatprep.mubr.msk.f32.mxu0 %vm1822_vm0, %v1823_v8  ;;  %1526 = vmatprep.mubr.msk.f32.mxu1 %vm1822_vm0, %v1823_v8  ;;  %s1829_s10 = smov 64   ;;  %s1830_s11 = smov 80   ;;  %vm1384_vm4 = vcmask 392192  }
   0x3   :  { %v1892_v9 = vpack.c.bf16 %v23_v5, %v22_v3  ;;  %v24_v10 = vld [vmem:[%s2133_s2 + $0x10] sm:$0xff]  ;;  %v25_v11 = vld [vmem:[%s2133_s2 + $0x18] sm:$0xff]  ;;  %v1901_v12 = vpack.c.bf16 %v29_v7, %v28_v6  ;;  %v31_v14 = vld [vmem:[%s2134_s1] sm:$0xff]  ;;  %vm1386_vm5 = vcmask 523264   ;;  %vm1388_vm6 = vcmask 654336  }
   0x4   :  { %1685 = vmatpush3.bf16.msra.mxu0 %v1877_v4  ;;  %v1905_v13 = vpack.c.bf16 %v25_v11, %v24_v10  ;;  %v32_v15 = vld [vmem:[%s2135_s0] sm:$0xff]  ;;  %v1406_v16 = vld [vmem:[%s2135_s0 + $0x8] sm:$0xff]  ;;  %v1409_v27 = vld [vmem:[%s2135_s0 + $0x10] sm:$0xff]  ;;  %vm1390_vm7 = vcmask 785408   ;;  %vm1392_vm8 = vcmask 916480  }
   0x5   :  { %1691 = vmatpush3.bf16.msra.mxu1 %v1892_v9  ;;  %1686 = vmatprep.subr.bf16.mxu0 %v1821_v0  ;;  %v1945_v18 = vld [vmem:[%s2136_s4] sm:$0xff]  ;;  %v1412_v35 = vld [vmem:[%s2135_s0 + $0x18] sm:$0xff]  ;;  %v1418_v50 = vld [vmem:[%s2135_s0 + $0x28] sm:$0xff] }
   0x6   :  { %1692 = vmatprep.subr.bf16.mxu1 %v1821_v0  ;;  %v1415_v42 = vld [vmem:[%s2135_s0 + $0x20] sm:$0xff]  ;;  %v1421_v58 = vld [vmem:[%s2135_s0 + $0x30] sm:$0xff]  ;;  %v1424_v3 = vld [vmem:[%s2135_s0 + $0x38] sm:$0xff]  ;;  %s1824_s0 = smov 96  }
   0x8   :  { %1688 = vmatpush3.bf16.msra.mxu0 %v1901_v12 }
   0x9   :  { %1694 = vmatpush3.bf16.msra.mxu1 %v1905_v13  ;;  %1695 = vmatprep.subr.bf16.mxu0 %v1821_v0 }
   0xa   :  { %1701 = vmatprep.subr.bf16.mxu1 %v1821_v0 }
   0xb   :  { %1516 = vmatmul.mubr.msk.f32.vlgmr.msra.gmra.mrb[0].mxu0 %vm33_vm1, %v31_v14 }
   0xc   :  { %1527 = vmatmul.mubr.msk.f32.vlgmr.msra.gmra.mrb[0].mxu1 %vm33_vm1, %v32_v15  ;;  %1697 = vmatpush3.bf16.msra.mxu0 %v1877_v4 }
   0xd   :  { %1703 = vmatpush3.bf16.msra.mxu1 %v1892_v9  ;;  %1698 = vmatprep.subr.bf16.mxu0 %v1821_v0 }
   0xe   :  { %1704 = vmatprep.subr.bf16.mxu1 %v1821_v0  ;;  %1548 = vmatprep.mubr.msk.f32.mxu1 %vm1822_vm0, %v1823_v8 }
   0xf   :  { %1537 = vmatprep.mubr.msk.f32.mxu0 %vm1822_vm0, %v1823_v8 }
  0x10   :  { %1700 = vmatpush3.bf16.msra.mxu0 %v1901_v12 }
  0x11   :  { %1706 = vmatpush3.bf16.msra.mxu1 %v1905_v13  ;;  %1707 = vmatprep.subr.bf16.mxu0 %v1821_v0 }
  0x12   :  { %1713 = vmatprep.subr.bf16.mxu1 %v1821_v0 }
  0x14   :  { %1549 = vmatmul.mubr.msk.f32.vlgmr.msra.gmra.mrb[2].mxu1 %vm33_vm1, %v1406_v16 }
  0x15   :  { %1715 = vmatpush3.bf16.msra.mxu1 %v1892_v9  ;;  %1570 = vmatprep.mubr.msk.f32.mxu1 %vm1822_vm0, %v1823_v8 }
  0x16   :  { %1716 = vmatprep.subr.bf16.mxu1 %v1821_v0 }
  0x19   :  { %1718 = vmatpush3.bf16.msra.mxu1 %v1905_v13 }
  0x1a   :  { %1725 = vmatprep.subr.bf16.mxu1 %v1821_v0 }
  0x1c   :  { %1571 = vmatmul.mubr.msk.f32.vlgmr.msra.gmra.mrb[4].mxu1 %vm33_vm1, %v1409_v27 }
  0x1d   :  { %1727 = vmatpush3.bf16.msra.mxu1 %v1892_v9  ;;  %1592 = vmatprep.mubr.msk.f32.mxu1 %vm1822_vm0, %v1823_v8 }
  0x1e   :  { %1728 = vmatprep.subr.bf16.mxu1 %v1821_v0 }
  0x21   :  { %1730 = vmatpush3.bf16.msra.mxu1 %v1905_v13 }
  0x22   :  { %1737 = vmatprep.subr.bf16.mxu1 %v1821_v0 }
  0x24   :  { %1593 = vmatmul.mubr.msk.f32.vlgmr.msra.gmra.mrb[6].mxu1 %vm33_vm1, %v1412_v35 }
  0x25   :  { %1739 = vmatpush3.bf16.msra.mxu1 %v1892_v9  ;;  %1614 = vmatprep.mubr.msk.f32.mxu1 %vm1822_vm0, %v1823_v8 }
  0x26   :  { %1740 = vmatprep.subr.bf16.mxu1 %v1821_v0 }
  0x29   :  { %1742 = vmatpush3.bf16.msra.mxu1 %v1905_v13 }
  0x2a   :  { %1749 = vmatprep.subr.bf16.mxu1 %v1821_v0 }
  0x2c   :  { %1615 = vmatmul.mubr.msk.f32.vlgmr.msra.gmra.mrb[8].mxu1 %vm33_vm1, %v1415_v42 }
  0x2d   :  { %1751 = vmatpush3.bf16.msra.mxu1 %v1892_v9  ;;  %1636 = vmatprep.mubr.msk.f32.mxu1 %vm1822_vm0, %v1823_v8 }
  0x2e   :  { %1752 = vmatprep.subr.bf16.mxu1 %v1821_v0 }
  0x31   :  { %1754 = vmatpush3.bf16.msra.mxu1 %v1905_v13 }
  0x32   :  { %1761 = vmatprep.subr.bf16.mxu1 %v1821_v0 }
  0x34   :  { %1637 = vmatmul.mubr.msk.f32.vlgmr.msra.gmra.mrb[10].mxu1 %vm33_vm1, %v1418_v50 }
  0x35   :  { %1763 = vmatpush3.bf16.msra.mxu1 %v1892_v9  ;;  %1658 = vmatprep.mubr.msk.f32.mxu1 %vm1822_vm0, %v1823_v8 }
  0x36   :  { %1764 = vmatprep.subr.bf16.mxu1 %v1821_v0 }
  0x39   :  { %1766 = vmatpush3.bf16.msra.mxu1 %v1905_v13 }
  0x3a   :  { %1773 = vmatprep.subr.bf16.mxu1 %v1821_v0 }
  0x3c   :  { %1659 = vmatmul.mubr.msk.f32.vlgmr.msra.gmra.mrb[12].mxu1 %vm33_vm1, %v1421_v58 }
  0x3d   :  { %1775 = vmatpush3.bf16.msra.mxu1 %v1892_v9  ;;  %1680 = vmatprep.mubr.msk.f32.mxu1 %vm1822_vm0, %v1823_v8 }
  0x3e   :  { %1776 = vmatprep.subr.bf16.mxu1 %v1821_v0 }
  0x41   :  { %1778 = vmatpush3.bf16.msra.mxu1 %v1905_v13 }
  0x44   :  { %1681 = vmatmul.mubr.msk.f32.vlgmr.msra.gmra.mrb[14].mxu1 %vm33_vm1, %v1424_v3 }
  0xde   :  { %v103_v17 = vpop.f32.mrb[0].mxu0 }
  0xdf   :  { %v176_v19 = vpop.f32.mrb[0].mxu1  ;;  %v1517_v20 = vpop.f32.mrb[1].mxu0 }
  0xe0   :  { %v177_v21 = vadd.f32 %v176_v19, %v103_v17  ;;  %v1528_v22 = vpop.f32.mrb[1].mxu1 }
  0xe2   :  { %v1948_v23 = vadd.f32 %v177_v21, %v1945_v18 }
  0xe4   :  { %1538 = vmatmul.mubr.msk.f32.vlgmr.msra.gmra.mrb[2].mxu0 %vm33_vm1, %v1948_v23  ;;  %v182_v24 = vsel %vm181_vm2, %v1948_v23, -inf }
  0xe5   :  { %183 = vmax.xlane.f32.xlu0 %v182_v24  ;;  %1709 = vmatpush3.bf16.msra.mxu0 %v1877_v4 }
  0xe6   :  { %1710 = vmatprep.subr.bf16.mxu0 %v1821_v0  ;;  %1559 = vmatprep.mubr.msk.f32.mxu0 %vm1822_vm0, %v1823_v8 }
  0xe7   :  { %v343_v25 = vpop.f32.mrb[2].mxu1 }
  0xe8   :  { %v1550_v26 = vpop.f32.mrb[3].mxu1 }
  0xe9   :  { %1712 = vmatpush3.bf16.msra.mxu0 %v1901_v12 }
  0xea   :  { %1719 = vmatprep.subr.bf16.mxu0 %v1821_v0 }
  0xef   :  { %v508_v33 = vpop.f32.mrb[4].mxu1 }
  0xf0   :  { %v1572_v34 = vpop.f32.mrb[5].mxu1 }
  0xf7   :  { %v673_v40 = vpop.f32.mrb[6].mxu1 }
  0xf8   :  { %v1594_v41 = vpop.f32.mrb[7].mxu1 }
  0xff   :  { %v838_v48 = vpop.f32.mrb[8].mxu1 }
 0x100   :  { %v1616_v49 = vpop.f32.mrb[9].mxu1 }
 0x107   :  { %v1003_v56 = vpop.f32.mrb[10].mxu1 }
 0x108   :  { %v1638_v57 = vpop.f32.mrb[11].mxu1 }
 0x10f   :  { %v1168_v1 = vpop.f32.mrb[12].mxu1 }
 0x110   :  { %v1660_v2 = vpop.f32.mrb[13].mxu1 }
 0x117   :  { %v1333_v26 = vpop.f32.mrb[14].mxu1 }
 0x118   :  { %v1682_v27 = vpop.f32.mrb[15].mxu1 }
 0x172   :  { %v184_v6 = vpop.xlane.xlu0 %183 }
 0x1b7   :  { %v270_v28 = vpop.f32.mrb[2].mxu0 }
 0x1b8   :  { %v344_v29 = vadd.f32 %v343_v25, %v270_v28  ;;  %v1539_v30 = vpop.f32.mrb[3].mxu0 }
 0x1ba   :  { %v1971_v31 = vadd.f32 %v344_v29, %v1945_v18 }
 0x1bc   :  { %1560 = vmatmul.mubr.msk.f32.vlgmr.msra.gmra.mrb[4].mxu0 %vm33_vm1, %v1971_v31  ;;  %v348_v32 = vsel %vm181_vm2, %v1971_v31, -inf }
 0x1bd   :  { %349 = vmax.xlane.f32.xlu0 %v348_v32  ;;  %1721 = vmatpush3.bf16.msra.mxu0 %v1877_v4 }
 0x1be   :  { %1722 = vmatprep.subr.bf16.mxu0 %v1821_v0  ;;  %1581 = vmatprep.mubr.msk.f32.mxu0 %vm1822_vm0, %v1823_v8 }
 0x1c1   :  { %1724 = vmatpush3.bf16.msra.mxu0 %v1901_v12 }
 0x1c2   :  { %1731 = vmatprep.subr.bf16.mxu0 %v1821_v0 }
 0x24a   :  { %v350_v13 = vpop.xlane.xlu0 %349 }
 0x24b   :  { %v351_v42 = vsub.f32 %v1971_v31, %v350_v13 }
 0x28f   :  { %v435_v36 = vpop.f32.mrb[4].mxu0 }
 0x290   :  { %v509_v37 = vadd.f32 %v508_v33, %v435_v36  ;;  %v1561_v38 = vpop.f32.mrb[5].mxu0 }
 0x292   :  { %v1994_v39 = vadd.f32 %v509_v37, %v1945_v18 }
 0x294   :  { %1582 = vmatmul.mubr.msk.f32.vlgmr.msra.gmra.mrb[6].mxu0 %vm33_vm1, %v1994_v39  ;;  %v513_v38 = vsel %vm181_vm2, %v1994_v39, -inf }
 0x295   :  { %1733 = vmatpush3.bf16.msra.mxu0 %v1877_v4  ;;  %1603 = vmatprep.mubr.msk.f32.mxu0 %vm1822_vm0, %v1823_v8 }
 0x296   :  { %1734 = vmatprep.subr.bf16.mxu0 %v1821_v0 }
 0x299   :  { %1736 = vmatpush3.bf16.msra.mxu0 %v1901_v12 }
 0x29a   :  { %1743 = vmatprep.subr.bf16.mxu0 %v1821_v0 }
 0x367   :  { %v600_v43 = vpop.f32.mrb[6].mxu0 }
 0x368   :  { %v674_v44 = vadd.f32 %v673_v40, %v600_v43  ;;  %v1583_v45 = vpop.f32.mrb[7].mxu0 }
 0x36a   :  { %v2015_v46 = vadd.f32 %v674_v44, %v1945_v18 }
 0x36c   :  { %1604 = vmatmul.mubr.msk.f32.vlgmr.msra.gmra.mrb[8].mxu0 %vm33_vm1, %v2015_v46  ;;  %v678_v47 = vsel %vm181_vm2, %v2015_v46, -inf }
 0x36d   :  { %679 = vmax.xlane.f32.xlu1 %v678_v47  ;;  %1745 = vmatpush3.bf16.msra.mxu0 %v1877_v4 }
 0x36e   :  { %1746 = vmatprep.subr.bf16.mxu0 %v1821_v0  ;;  %1625 = vmatprep.mubr.msk.f32.mxu0 %vm1822_vm0, %v1823_v8 }
 0x371   :  { %1748 = vmatpush3.bf16.msra.mxu0 %v1901_v12 }
 0x372   :  { %1755 = vmatprep.subr.bf16.mxu0 %v1821_v0 }
 0x43f   :  { %v765_v51 = vpop.f32.mrb[8].mxu0 }
 0x440   :  { %v839_v52 = vadd.f32 %v838_v48, %v765_v51  ;;  %v1605_v53 = vpop.f32.mrb[9].mxu0 }
 0x442   :  { %v842_v54 = vadd.f32 %v839_v52, %v1945_v18 }
 0x444   :  { %1626 = vmatmul.mubr.msk.f32.vlgmr.msra.gmra.mrb[10].mxu0 %vm33_vm1, %v842_v54  ;;  %v843_v55 = vsel %vm181_vm2, %v842_v54, -inf }
 0x445   :  { %844 = vmax.xlane.f32.xlu1 %v843_v55  ;;  %1757 = vmatpush3.bf16.msra.mxu0 %v1877_v4 }
 0x446   :  { %1758 = vmatprep.subr.bf16.mxu0 %v1821_v0  ;;  %1647 = vmatprep.mubr.msk.f32.mxu0 %vm1822_vm0, %v1823_v8 }
 0x449   :  { %1760 = vmatpush3.bf16.msra.mxu0 %v1901_v12 }
 0x44a   :  { %1767 = vmatprep.subr.bf16.mxu0 %v1821_v0 }
 0x517   :  { %v930_v59 = vpop.f32.mrb[10].mxu0 }
 0x518   :  { %v1004_v60 = vadd.f32 %v1003_v56, %v930_v59  ;;  %v1627_v61 = vpop.f32.mrb[11].mxu0 }
 0x51a   :  { %v1007_v62 = vadd.f32 %v1004_v60, %v1945_v18 }
 0x51c   :  { %1648 = vmatmul.mubr.msk.f32.vlgmr.msra.gmra.mrb[12].mxu0 %vm33_vm1, %v1007_v62  ;;  %v1008_v63 = vsel %vm181_vm2, %v1007_v62, -inf }
 0x51d   :  { %1009 = vmax.xlane.f32.xlu0 %v1008_v63  ;;  %1769 = vmatpush3.bf16.msra.mxu0 %v1877_v4 }
 0x51e   :  { %1770 = vmatprep.subr.bf16.mxu0 %v1821_v0  ;;  %1669 = vmatprep.mubr.msk.f32.mxu0 %vm1822_vm0, %v1823_v8  ;;  %v2069_v0 = vsub.f32 %v1948_v23, %v184_v6  ;;  %v680_v8 = vpop.xlane.xlu1 %679 }
 0x520   :  { %v186_v11 = vmul.f32 1.442695, %v2069_v0 }
 0x521   :  { %1772 = vmatpush3.bf16.msra.mxu0 %v1901_v12  ;;  %v2075_v12 = vsub.f32 %v2015_v46, %v680_v8 }
 0x522   :  { %v845_v14 = vpop.xlane.xlu1 %844  ;;  %1789 = vpow2.f32 %v186_v11 }
 0x523   :  { %v682_v15 = vmul.f32 1.442695, %v2075_v12  ;;  %v2078_v16 = vsub.f32 %v842_v54, %v845_v14 }
 0x525   :  { %1791 = vpow2.f32 %v682_v15  ;;  %v847_v19 = vmul.f32 1.442695, %v2078_v16 }
 0x527   :  { %1793 = vpow2.f32 %v847_v19 }
 0x52c   :  { %v1790_v22 = vpop.eup %1789 }
 0x52f   :  { %v1792_v23 = vpop.eup %1791 }
 0x531   :  { %v1794_v24 = vpop.eup %1793 }
 0x5aa   :  { %v1010_v17 = vpop.xlane.xlu0 %1009 }
 0x5ab   :  { %v2081_v20 = vsub.f32 %v1007_v62, %v1010_v17 }
 0x5ad   :  { %v1012_v21 = vmul.f32 1.442695, %v2081_v20 }
 0x5af   :  { %1795 = vpow2.f32 %v1012_v21 }
 0x5b9   :  { %v1796_v25 = vpop.eup %1795 }
 0x5ef   :  { %v1095_v5 = vpop.f32.mrb[12].mxu0 }
 0x5f0   :  { %v1169_v7 = vadd.f32 %v1168_v1, %v1095_v5  ;;  %v1649_v9 = vpop.f32.mrb[13].mxu0 }
 0x5f2   :  { %v1172_v4 = vadd.f32 %v1169_v7, %v1945_v18 }
 0x5f4   :  { %1670 = vmatmul.mubr.msk.f32.vlgmr.msra.gmra.mrb[14].mxu0 %vm33_vm1, %v1172_v4  ;;  %v1173_v10 = vsel %vm181_vm2, %v1172_v4, -inf }
 0x5f5   :  { %1174 = vmax.xlane.f32.xlu1 %v1173_v10 }
 0x606   :  { %189 = vrot.lane.b32.xlu1 %v1790_v22, %s1824_s0 }
 0x60a   :  { %685 = vrot.lane.b32.xlu1 %v1792_v23, %s1824_s0 }
 0x60e   :  { %850 = vrot.lane.b32.xlu1 %v1794_v24, %s1824_s0 }
 0x612   :  { %1015 = vrot.lane.b32.xlu1 %v1796_v25, %s1824_s0 }
 0x682   :  { %v1175_v28 = vpop.xlane.xlu1 %1174 }
 0x683   :  { %v2088_v29 = vsub.f32 %v1172_v4, %v1175_v28 }
 0x685   :  { %v1177_v30 = vmul.f32 1.442695, %v2088_v29 }
 0x686   :  { %v190_v40 = vpop.permute.xlu1 %189 }
 0x687   :  { %1797 = vpow2.f32 %v1177_v30  ;;  %v193_v41 = vsel %vm192_vm3, %v190_v40, 0.0 }
 0x68a   :  { %v686_v31 = vpop.permute.xlu1 %685 }
 0x68b   :  { %v688_v55 = vsel %vm192_vm3, %v686_v31, 0.0 }
 0x68e   :  { %v851_v54 = vpop.permute.xlu1 %850 }
 0x691   :  { %v1798_v32 = vpop.eup %1797 }
 0x692   :  { %1180 = vrot.lane.b32.xlu1 %v1798_v32, %s1824_s0  ;;  %v1016_v57 = vpop.permute.xlu1 %1015 }
 0x693   :  { %v1018_v58 = vsel %vm192_vm3, %v1016_v57, 0.0 }
 0x6c7   :  { %v1260_v33 = vpop.f32.mrb[14].mxu0 }
 0x6c8   :  { %v1334_v34 = vadd.f32 %v1333_v26, %v1260_v33  ;;  %v1671_v35 = vpop.f32.mrb[15].mxu0 }
 0x6ca   :  { %v1337_v36 = vadd.f32 %v1334_v34, %v1945_v18  ;;  %v352_v18 = vmul.f32 1.442695, %v351_v42 }
 0x6cc   :  { %1395 = vst.msk [vmem:[%s2137_s6] sm:$0xff] %vm33_vm1, %v1337_v36  ;;  %v1338_v37 = vsel %vm181_vm2, %v1337_v36, -inf  ;;  %1799 = vpow2.f32 %v352_v18  ;;  %s1825_s6 = smov 112  }
 0x6cd   :  { %1339 = vmax.xlane.f32.xlu0 %v1338_v37 }
 0x6d1   :  { %514 = vmax.xlane.f32.xlu0 %v513_v38 }
 0x6d5   :  { %194 = vadd.xlane.f32.xlu0 %v193_v41 }
 0x6d6   :  { %v1800_v43 = vpop.eup %1799 }
 0x6eb   :  { %355 = vrot.lane.b32.xlu0 %v1800_v43, %s1824_s0 }
 0x704   :  { %v1181_v59 = vpop.permute.xlu1 %1180 }
 0x705   :  { %v1183_v60 = vsel %vm192_vm3, %v1181_v59, 0.0 }
 0x75a   :  { %v1340_v44 = vpop.xlane.xlu0 %1339 }
 0x75b   :  { %v2103_v45 = vsub.f32 %v1337_v36, %v1340_v44 }
 0x75d   :  { %v1342_v46 = vmul.f32 1.442695, %v2103_v45 }
 0x75e   :  { %v515_v47 = vpop.xlane.xlu0 %514 }
 0x75f   :  { %1801 = vpow2.f32 %v1342_v46  ;;  %v2107_v48 = vsub.f32 %v1994_v39, %v515_v47  ;;  %v853_v39 = vsel %vm192_vm3, %v851_v54, 0.0 }
 0x761   :  { %v517_v49 = vmul.f32 1.442695, %v2107_v48 }
 0x762   :  { %v195_v50 = vpop.xlane.xlu0 %194 }
 0x763   :  { %1803 = vpow2.f32 %v517_v49 }
 0x764   :  { %1805 = vlog2.f32 %v195_v50 }
 0x766   :  { %v356_v51 = vpop.permute.xlu0 %355 }
 0x767   :  { %v358_v52 = vsel %vm192_vm3, %v356_v51, 0.0 }
 0x768   :  { %359 = vadd.xlane.f32.xlu0 %v358_v52 }
 0x769   :  { %v1802_v53 = vpop.eup %1801 }
 0x76a   :  { %1345 = vrot.lane.b32.xlu1 %v1802_v53, %s1824_s0 }
 0x76c   :  { %689 = vadd.xlane.f32.xlu0 %v688_v55 }
 0x76d   :  { %v1804_v56 = vpop.eup %1803 }
 0x76e   :  { %520 = vrot.lane.b32.xlu1 %v1804_v56, %s1824_s0  ;;  %v1806_v61 = vpop.eup %1805 }
 0x76f   :  { %v197_v62 = vmul.f32 0.6931472, %v1806_v61 }
 0x770   :  { %854 = vadd.xlane.f32.xlu0 %v853_v39 }
 0x771   :  { %v198_v63 = vsub.f32 %v2069_v0, %v197_v62 }
 0x774   :  { %1019 = vadd.xlane.f32.xlu0 %v1018_v58 }
 0x778   :  { %1184 = vadd.xlane.f32.xlu0 %v1183_v60 }
 0x78e   :  { %1355 = vrot.lane.b32.xlu0 %v198_v63, %s1824_s0 }
 0x7dc   :  { %v1346_v1 = vpop.permute.xlu1 %1345 }
 0x7dd   :  { %v1348_v5 = vsel %vm192_vm3, %v1346_v1, 0.0 }
 0x7e0   :  { %v521_v2 = vpop.permute.xlu1 %520 }
 0x7e1   :  { %v523_v3 = vsel %vm192_vm3, %v521_v2, 0.0 }
 0x7e2   :  { %524 = vadd.xlane.f32.xlu1 %v523_v3 }
 0x7e6   :  { %1349 = vadd.xlane.f32.xlu1 %v1348_v5 }
 0x7f5   :  { %v360_v6 = vpop.xlane.xlu0 %359 }
 0x7f6   :  { %1807 = vlog2.f32 %v360_v6 }
 0x7f9   :  { %v690_v7 = vpop.xlane.xlu0 %689 }
 0x7fa   :  { %1809 = vlog2.f32 %v690_v7 }
 0x7fd   :  { %v855_v9 = vpop.xlane.xlu0 %854 }
 0x7fe   :  { %1811 = vlog2.f32 %v855_v9 }
 0x800   :  { %v1808_v4 = vpop.eup %1807 }
 0x801   :  { %v362_v8 = vmul.f32 0.6931472, %v1808_v4  ;;  %v1020_v10 = vpop.xlane.xlu0 %1019 }
 0x802   :  { %1813 = vlog2.f32 %v1020_v10 }
 0x803   :  { %v363_v0 = vsub.f32 %v351_v42, %v362_v8 }
 0x804   :  { %v1810_v11 = vpop.eup %1809 }
 0x805   :  { %v692_v13 = vmul.f32 0.6931472, %v1810_v11  ;;  %1359 = vrot.lane.b32.xlu1 %v363_v0, %s1825_s6  ;;  %v1185_v14 = vpop.xlane.xlu0 %1184 }
 0x806   :  { %1815 = vlog2.f32 %v1185_v14 }
 0x807   :  { %v693_v15 = vsub.f32 %v2075_v12, %v692_v13 }
 0x808   :  { %v1812_v17 = vpop.eup %1811 }
 0x809   :  { %v857_v19 = vmul.f32 0.6931472, %v1812_v17  ;;  %1363 = vrot.lane.b32.xlu1 %v693_v15, %s1826_s7  ;;  %v1356_v37 = vpop.permute.xlu0 %1355 }
 0x80b   :  { %v858_v21 = vsub.f32 %v2078_v16, %v857_v19 }
 0x80c   :  { %v1814_v22 = vpop.eup %1813 }
 0x80d   :  { %v1022_v23 = vmul.f32 0.6931472, %v1814_v22  ;;  %1367 = vrot.lane.b32.xlu1 %v858_v21, %s1827_s8 }
 0x80f   :  { %v1023_v24 = vsub.f32 %v2081_v20, %v1022_v23 }
 0x810   :  { %v1816_v25 = vpop.eup %1815 }
 0x811   :  { %v1187_v26 = vmul.f32 0.6931472, %v1816_v25  ;;  %1371 = vrot.lane.b32.xlu0 %v1023_v24, %s1828_s9 }
 0x813   :  { %v1188_v27 = vsub.f32 %v2088_v29, %v1187_v26 }
 0x815   :  { %1375 = vrot.lane.b32.xlu1 %v1188_v27, %s1829_s10 }
 0x86f   :  { %v525_v12 = vpop.xlane.xlu1 %524 }
 0x873   :  { %v1350_v28 = vpop.xlane.xlu1 %1349 }
 0x874   :  { %1817 = vlog2.f32 %v1350_v28 }
 0x875   :  { %1819 = vlog2.f32 %v525_v12 }
 0x877   :  { %v1360_v20 = vpop.permute.xlu1 %1359 }
 0x878   :  { %v1382_v29 = vsel %vm192_vm3, %v1356_v37, %v1360_v20 }
 0x87b   :  { %v1364_v35 = vpop.permute.xlu1 %1363 }
 0x87e   :  { %v1818_v30 = vpop.eup %1817 }
 0x87f   :  { %v1352_v32 = vmul.f32 0.6931472, %v1818_v30  ;;  %v1820_v33 = vpop.eup %1819  ;;  %v1368_v40 = vpop.permute.xlu1 %1367 }
 0x880   :  { %v527_v34 = vmul.f32 0.6931472, %v1820_v33 }
 0x881   :  { %v1353_v16 = vsub.f32 %v2103_v45, %v1352_v32 }
 0x882   :  { %v528_v36 = vsub.f32 %v2107_v48, %v527_v34 }
 0x883   :  { %1379 = vrot.lane.b32.xlu0 %v1353_v16, %s1830_s11  ;;  %v1372_v42 = vpop.permute.xlu0 %1371 }
 0x884   :  { %v1383_v38 = vsel %vm33_vm1, %v1382_v29, %v528_v36 }
 0x885   :  { %v1385_v41 = vsel %vm1384_vm4, %v1383_v38, %v1364_v35 }
 0x886   :  { %v1387_v43 = vsel %vm1386_vm5, %v1385_v41, %v1368_v40 }
 0x887   :  { %v1376_v18 = vpop.permute.xlu1 %1375  ;;  %v1389_v44 = vsel %vm1388_vm6, %v1387_v43, %v1372_v42 }
 0x888   :  { %v1391_v45 = vsel %vm1390_vm7, %v1389_v44, %v1376_v18 }
 0x8f5   :  { %v1380_v46 = vpop.permute.xlu0 %1379 }
 0x8f6   :  { %v1393_v47 = vsel %vm1392_vm8, %v1391_v45, %v1380_v46 }
 0x8f7   :  { %1394 = vst [vmem:[%s2138_s5] sm:$0xff] %v1393_v47 }

</bundles_post_ra>
